<compile_context>
chip_gen: v5e
topology: v5e:2x2
jax: 0.10.0
libtpu: 0.0.40
codegen_flags: <defaults>
</compile_context>

<pallas_src>
import jax
import jax.numpy as jnp
from jax.experimental import pallas as pl
from jax.experimental.pallas import tpu as pltpu


# -----------------------------------------------------------------------------
# Kernel
# -----------------------------------------------------------------------------
def _cgn_tile_kernel(f2_param_ref, g2_param_ref, f2_out_ref, g2_out_ref):
    """One grid step = (tb batch rows) x (one lane tile of flattened g2).

    f2_param_ref : (1, dim_z)      -- constant block index -> fetched once
    g2_param_ref : (1, lane_tile)  -- lane tile `l` of the flattened g2 param
    f2_out_ref   : (tb, dim_z)     -- resident across the lane axis
    g2_out_ref   : (tb, lane_tile) -- new block every step
    """
    # g2: sublane-broadcast the parameter row over the tb batch rows.
    g2_out_ref[...] = jnp.broadcast_to(g2_param_ref[...], g2_out_ref.shape)

    # f2: the output block index ignores the lane axis, so the buffer stays
    # resident for all lane steps of this batch block and is written back to
    # HBM exactly once.  Fill it only on the first lane visit.
    @pl.when(pl.program_id(1) == 0)
    def _():
        f2_out_ref[...] = jnp.broadcast_to(f2_param_ref[...], f2_out_ref.shape)


# -----------------------------------------------------------------------------
# Tiling heuristics
# -----------------------------------------------------------------------------
_LANE_TILE_CAP = 32 * 1024       # max lanes per g2 block (multiple of 128)
_TARGET_BLOCK_BYTES = 8 << 20    # ~8 MiB of g2 output per grid step


def _pick_lane_tile(g_lanes, cap=_LANE_TILE_CAP):
    """Lane tile for the flattened g2 row.

    Full extent when small (always a legal last block dim); otherwise a
    128-multiple cap so VMEM stays bounded independent of dim_z.
    """
    if g_lanes <= cap:
        return int(g_lanes)
    return int((cap // 128) * 128)


def _pick_batch_block(batch_size, row_bytes, target_bytes=_TARGET_BLOCK_BYTES):
    """Pick tb (batch rows per grid step) targeting ~target_bytes per step.

    tb is the full batch or a multiple of 8; keep >= 2 batch blocks when the
    batch allows it (so the 'parallel' axis can shard across v7x's two
    TensorCores); prefer a tb that divides batch_size exactly (no ragged tail).
    """
    tb = max(1, int(target_bytes) // max(1, int(row_bytes)))
    if tb >= batch_size:
        tb = int(batch_size)
    else:
        tb = max(8, (tb // 8) * 8)
        tb = min(tb, int(batch_size))

    # Megacore (v7x): ensure at least two batch blocks when batch_size >= 16.
    if batch_size >= 16:
        half8 = ((batch_size // 2) // 8) * 8
        if half8 >= 8:
            tb = min(tb, half8)

    # Prefer an exact divisor of batch_size (avoids the clipped trailing
    # block), but never shrink the block by more than ~2x.
    if 8 <= tb < batch_size and batch_size % tb != 0:
        for cand in range(tb, max(7, tb // 2 - 1), -8):
            if batch_size % cand == 0:
                tb = cand
                break
    return int(tb)


# -----------------------------------------------------------------------------
# Wrapper
# -----------------------------------------------------------------------------
def cgn_forward(f2_param, g2_param, batch_size, out_dtype=None):
    """Pallas equivalent of CGN.forward(batch_size) -> [f2, g2].

    f2_param: (dim_z, 1)     -> f2: (batch_size, dim_z, 1)
    g2_param: (dim_z, dim_z) -> g2: (batch_size, dim_z, dim_z)

    out_dtype: optional narrower output dtype (e.g. jnp.bfloat16); the params
    are cast once here so the kernel only stores.
    """
    dim_z = f2_param.shape[0]
    assert f2_param.shape == (dim_z, 1)
    assert g2_param.shape == (dim_z, dim_z)

    dtype = jnp.dtype(out_dtype) if out_dtype is not None else jnp.dtype(f2_param.dtype)
    esize = dtype.itemsize
    g_lanes = dim_z * dim_z

    # Lane-dense flat parameter rows (row-major no-op reshapes; cast once).
    f2_row = f2_param.reshape(1, dim_z).astype(dtype)
    g2_row = g2_param.reshape(1, g_lanes).astype(dtype)

    lane_tile = _pick_lane_tile(g_lanes)
    tb = _pick_batch_block(batch_size, row_bytes=esize * (lane_tile + dim_z))
    nb = pl.cdiv(batch_size, tb)
    nl = pl.cdiv(g_lanes, lane_tile)

    # VMEM: double-buffered output blocks + double-buffered param blocks + slack.
    out_block_bytes = esize * tb * (lane_tile + dim_z)
    in_block_bytes = esize * (lane_tile + dim_z)
    vmem_need = 2 * out_block_bytes + 2 * in_block_bytes
    vmem_limit = int(min(vmem_need + (8 << 20), 48 << 20))  # safe on v7x's 64 MiB

    # TODO(synk): for dim_z < 128 the f2 block is lane-masked (vst.msk); it is
    # <=1/(dim_z+1) of total bytes, so it is left as-is per the review.
    f2_flat, g2_flat = pl.pallas_call(
        _cgn_tile_kernel,
        out_shape=(
            jax.ShapeDtypeStruct((batch_size, dim_z), dtype),
            jax.ShapeDtypeStruct((batch_size, g_lanes), dtype),
        ),
        grid=(nb, nl),
        in_specs=[
            # Constant block index -> revisit skips the redundant HBM fetch.
            pl.BlockSpec((1, dim_z), lambda b, l: (0, 0)),
            # One lane tile of the flattened g2 parameter row.
            pl.BlockSpec((1, lane_tile), lambda b, l: (0, l)),
        ],
        out_specs=(
            # Resident across the lane axis: written back once per batch block.
            pl.BlockSpec((tb, dim_z), lambda b, l: (b, 0)),
            # Lane-dense (tb, lane_tile) slab, new block every step.
            pl.BlockSpec((tb, lane_tile), lambda b, l: (b, l)),
        ),
        compiler_params=pltpu.CompilerParams(
            dimension_semantics=("parallel", "arbitrary"),
            vmem_limit_bytes=vmem_limit,
        ),
    )(f2_row, g2_row)

    # Row-major no-op reshapes back to the PyTorch layout.
    f2 = f2_flat.reshape(batch_size, dim_z, 1)
    g2 = g2_flat.reshape(batch_size, dim_z, dim_z)
    return [f2, g2]


if __name__ == "__main__":
    # dim_z = z_h * z_w * 2 ; pick small z_h = z_w = 4 -> dim_z = 32
    z_h, z_w = 4, 4
    dim_z = z_h * z_w * 2
    batch_size = 2

    key = jax.random.PRNGKey(0)
    k_f2, k_g2 = jax.random.split(key)

    # Deterministic init mirroring the PyTorch __init__:
    #   f2_param = 1/sqrt(dim_z) * rand(dim_z, 1)
    #   g2_param = 1/dim_z       * rand(dim_z, dim_z)
    f2_param = (1.0 / dim_z ** 0.5) * jax.random.uniform(
        k_f2, (dim_z, 1), dtype=jnp.float32)
    g2_param = (1.0 / dim_z) * jax.random.uniform(
        k_g2, (dim_z, dim_z), dtype=jnp.float32)

    f2, g2 = cgn_forward(f2_param, g2_param, batch_size)
    jax.block_until_ready(f2)
    jax.block_until_ready(g2)

    # Reference check: forward is just a batch-tile of the parameters.
    f2_ref = jnp.broadcast_to(f2_param[None], (batch_size, dim_z, 1))
    g2_ref = jnp.broadcast_to(g2_param[None], (batch_size, dim_z, dim_z))
    assert f2.shape == (batch_size, dim_z, 1)
    assert g2.shape == (batch_size, dim_z, dim_z)
    assert jnp.allclose(f2, f2_ref)
    assert jnp.allclose(g2, g2_ref)

    print("KERNEL_OK")
</pallas_src>

<mosaic_0001>
module attributes {stable_mosaic.version = 11 : i64} {
  func.func @_cgn_tile_kernel(%arg0: i32, %arg1: i32, %arg2: memref<1x32xf32, #tpu.memory_space<vmem>>, %arg3: memref<1x1024xf32, #tpu.memory_space<vmem>>, %arg4: memref<2x32xf32, #tpu.memory_space<vmem>>, %arg5: memref<2x1024xf32, #tpu.memory_space<vmem>>) attributes {dimension_semantics = [#tpu.dimension_semantics<parallel>, #tpu.dimension_semantics<arbitrary>], iteration_bounds = array<i64: 1, 1>, scalar_prefetch = 0 : i64, scratch_operands = 0 : i64, tpu.core_type = #tpu.core_type<tc>, window_params = [{pipeline_mode = #tpu.pipeline_mode<synchronous>, transform_indices = @transform_0, window_bounds = array<i64: 1, 32>}, {transform_indices = @transform_1, window_bounds = array<i64: 1, 1024>}, {transform_indices = @transform_2, window_bounds = array<i64: 2, 32>}, {transform_indices = @transform_3, window_bounds = array<i64: 2, 1024>}]} {
    %c0 = arith.constant 0 : index
    %c0_0 = arith.constant 0 : index
    %0 = vector.load %arg3[%c0, %c0_0] : memref<1x1024xf32, #tpu.memory_space<vmem>>, vector<1x1024xf32>
    %1 = vector.shape_cast %0 : vector<1x1024xf32> to vector<1x1024xf32>
    %2 = vector.broadcast %1 : vector<1x1024xf32> to vector<2x1024xf32>
    %c0_1 = arith.constant 0 : index
    %c0_2 = arith.constant 0 : index
    %3 = vector.load %arg5[%c0_1, %c0_2] : memref<2x1024xf32, #tpu.memory_space<vmem>>, vector<2x1024xf32>
    tpu.vector_store %arg5[%c0_1, %c0_2], %2 {strides = array<i32>} : memref<2x1024xf32, #tpu.memory_space<vmem>>, vector<2x1024xf32>,
    %c0_i32 = arith.constant 0 : i32
    %4 = arith.cmpi eq, %arg1, %c0_i32 : i32
    %5 = arith.extui %4 : i1 to i32
    %c0_i32_3 = arith.constant 0 : i32
    %6 = arith.cmpi ne, %5, %c0_i32_3 : i32
    scf.if %6 {
      %c0_4 = arith.constant 0 : index
      %c0_5 = arith.constant 0 : index
      %7 = vector.load %arg2[%c0_4, %c0_5] : memref<1x32xf32, #tpu.memory_space<vmem>>, vector<1x32xf32>
      %8 = vector.shape_cast %7 : vector<1x32xf32> to vector<1x32xf32>
      %9 = vector.broadcast %8 : vector<1x32xf32> to vector<2x32xf32>
      %c0_6 = arith.constant 0 : index
      %c0_7 = arith.constant 0 : index
      %10 = vector.load %arg4[%c0_6, %c0_7] : memref<2x32xf32, #tpu.memory_space<vmem>>, vector<2x32xf32>
      tpu.vector_store %arg4[%c0_6, %c0_7], %9 {strides = array<i32>} : memref<2x32xf32, #tpu.memory_space<vmem>>, vector<2x32xf32>,
    } else {
    }
    return
  }
  func.func @transform_0(%arg0: i32, %arg1: i32) -> (i32, i32) {
    %c0_i32 = arith.constant 0 : i32
    %c0_i32_0 = arith.constant 0 : i32
    %c0_i32_1 = arith.constant 0 : i32
    return %c0_i32, %c0_i32_0 : i32, i32
  }
  func.func @transform_1(%arg0: i32, %arg1: i32) -> (i32, i32) {
    %c0_i32 = arith.constant 0 : i32
    %c0_i32_0 = arith.constant 0 : i32
    return %c0_i32, %arg1 : i32, i32
  }
  func.func @transform_2(%arg0: i32, %arg1: i32) -> (i32, i32) {
    %c0_i32 = arith.constant 0 : i32
    %c0_i32_0 = arith.constant 0 : i32
    return %arg0, %c0_i32 : i32, i32
  }
  func.func @transform_3(%arg0: i32, %arg1: i32) -> (i32, i32) {
    %c0_i32 = arith.constant 0 : i32
    return %arg0, %arg1 : i32, i32
  }
}

</mosaic_0001>

<bundles_post_ra>
// kernel: tpu_custom_call.1
= control target key start
LH: loop header
LB: loop body
LE: loop exit
PB: predicated region body
PF: predicated region fallthrough
CT: control target
= control target key end

     0   :  { %9 = vsyncpa [#allocation3], 0  ;;  %s266_s0 = inlined_call_operand.hbm [shape: f32[1,32], index: 0, kind: input, shape index: {}]   ;;  %s267_s1 = inlined_call_operand.hbm [shape: f32[1,1024], index: 1, kind: input, shape index: {}]   ;;  %s268_s2 = inlined_call_operand.hbm [shape: f32[2,32], index: 2, kind: output, shape index: {0}]   ;;  %s269_s3 = inlined_call_operand.hbm [shape: f32[2,1024], index: 3, kind: output, shape index: {1}]  }
   0x1   :  { %10 = vsyncpa [#allocation6], 0 }
   0x2   :  { %11 = vsyncpa [#allocation4], 0 }
   0x3   :  { %12 = vsyncpa [#allocation9], 0  ;;  %s18_s14 = sshll.u32 %s266_s0, 4  ;;  %s225_s15 = smov [#allocation2]   ;;  %s19_s14 = int_to_ptr.hbm [resolvable:$true] %s18_s14 }
   0x4   :  { %s20_s16 = sshll.u32 %s225_s15, 4  ;;  %s29_s19 = sshll.u32 %s267_s1, 4  ;;  %s21_s16 = int_to_ptr.vmem [resolvable:$true] %s20_s16  ;;  %s30_s19 = int_to_ptr.hbm [resolvable:$true] %s29_s19 }
   0x5   :  { %23 = dma.hbm_to_vmem [thread:$0]  %s19_s14, 16, %s21_s16, [#allocation3]  }
   0x6   :  { %s226_s20 = smov [#allocation5]  }
   0x7   :  { %s31_s21 = sshll.u32 %s226_s20, 4  ;;  %s32_s21 = int_to_ptr.vmem [resolvable:$true] %s31_s21 }
   0x8   :  { %34 = dma.hbm_to_vmem [thread:$0]  %s30_s19, 128, %s32_s21, [#allocation6]  }
   0x9   :  { %217 = dma.done.wait [#allocation3], 16  }
   0xa   :  { %218 = vsyncadd [#allocation3], 4294967280 }
   0xb   :  { %219 = dma.done.wait [#allocation6], 128  }
   0xc   :  { %220 = vsyncadd [#allocation6], 4294967168  ;;  %s227_s22 = smov [#allocation7]   ;;  %s89_s25 = sshll.u32 %s268_s2, 4  ;;  %vm59_vm0 = vcmask 1041408   ;;  %vm80_vm1 = vcmask 254976   ;;  %s90_s25 = int_to_ptr.hbm [resolvable:$true] %s89_s25 }
   0xd   :  { %s87_s0 = sshll.u32 %s227_s22, 4  ;;  %v43_v0 = vld [vmem:[#allocation5] sm:$0xff]  ;;  %vm61_vm2 = vcmask 1045508   ;;  %v120_v1 = vld [vmem:[#allocation2] ss:$0 sm:$0xff]  ;;  %s228_s1 = smov [#allocation8]   ;;  %s88_s0 = int_to_ptr.vmem [resolvable:$true] %s87_s0 }
   0xe   :  { %v45_v2 = vperm.slane %v43_v0, 0  ;;  %v46_v3 = vperm.slane %v43_v0, 1  ;;  %v47_v4 = vperm.slane %v43_v0, 2  ;;  %v48_v5 = vperm.slane %v43_v0, 3  ;;  %s98_s26 = sshll.u32 %s228_s1, 4  ;;  %s100_s29 = sshll.u32 %s269_s3, 4  ;;  %s99_s26 = int_to_ptr.vmem [resolvable:$true] %s98_s26  ;;  %s101_s29 = int_to_ptr.hbm [resolvable:$true] %s100_s29 }
   0xf   :  { %v49_v6 = vperm.slane %v43_v0, 4  ;;  %v50_v7 = vperm.slane %v43_v0, 5  ;;  %v51_v8 = vperm.slane %v43_v0, 6  ;;  %v52_v9 = vperm.slane %v43_v0, 7  ;;  %81 = vst.msk [vmem:[#allocation7] sm:$0x3] %vm80_vm1, %v120_v1 }
  0x10   :  { %v53_v10 = vrot.slane %v46_v3, 6  ;;  %v54_v11 = vrot.slane %v47_v4, 4  ;;  %v55_v12 = vrot.slane %v48_v5, 2  ;;  %vm63_vm3 = vcmask 1043456   ;;  %92 = dma.vmem_to_hbm [thread:$0]  %s88_s0, 32, %s90_s25, [#allocation4]  }
  0x11   :  { %v56_v13 = vrot.slane %v50_v7, 6  ;;  %v57_v14 = vrot.slane %v51_v8, 4  ;;  %v58_v15 = vrot.slane %v52_v9, 2 }
  0x12   :  { %v60_v16 = vsel %vm59_vm0, %v45_v2, %v53_v10  ;;  %v62_v17 = vsel %vm61_vm2, %v54_v11, %v55_v12 }
  0x13   :  { %v64_v18 = vsel %vm63_vm3, %v60_v16, %v62_v17  ;;  %v65_v19 = vsel %vm59_vm0, %v49_v6, %v56_v13  ;;  %v66_v20 = vsel %vm61_vm2, %v57_v14, %v58_v15 }
  0x14   :  { %70 = vst [vmem:[#allocation8] sm:$0xff] %v64_v18  ;;  %v67_v21 = vsel %vm63_vm3, %v65_v19, %v66_v20 }
  0x15   :  { %71 = vst [vmem:[#allocation8 + $0x8] sm:$0xff] %v67_v21 }
  0x16   :  { %103 = dma.vmem_to_hbm [thread:$0]  %s99_s26, 256, %s101_s29, [#allocation9]  }
  0x17   :  { %221 = dma.done.wait [#allocation4], 32  }
  0x18   :  { %222 = vsyncadd [#allocation4], 4294967264 }
  0x19   :  { %223 = dma.done.wait [#allocation9], 256  }
  0x1a   :  { %224 = vsyncadd [#allocation9], 4294967040 }
  0x1b   :  { %112 = vsyncpa [#allocation3], 1 }
  0x1c   :  { %113 = vsyncpa [#allocation6], 1 }
  0x1d   :  { %114 = vsyncpa [#allocation4], 1 }
  0x1e   :  { %115 = vsyncpa [#allocation9], 1 }

</bundles_post_ra>
